<compile_context>
chip_gen: v7x
topology: tpu7x:2x2x1
jax: 0.10.0
libtpu: 0.0.40
codegen_flags: <defaults>
</compile_context>

<pallas_src>
import functools

import jax
import jax.numpy as jnp
from jax.experimental import pallas as pl
from jax.experimental.pallas import tpu as pltpu


def _layernorm_kernel(x_ref, gamma_ref, beta_ref, o_ref, *, eps, feat, feat_padded):
    # Load tile and compute in f32 regardless of the I/O dtype.
    x = x_ref[...].astype(jnp.float32)                       # (TM, Fp)

    masked = feat != feat_padded
    if masked:
        lane = jax.lax.broadcasted_iota(jnp.int32, x.shape, dimension=1)
        mask = lane < feat
        x = jnp.where(mask, x, 0.0)                          # zero padded lanes

    # Mean over the TRUE feature count (padded lanes contribute zero).
    mean = jnp.sum(x, axis=-1, keepdims=True) * (1.0 / feat)
    centered = x - mean
    if masked:
        centered = jnp.where(mask, centered, 0.0)

    # torch.std default is unbiased (Bessel correction, N-1 denominator).
    # Guard feat == 1 against divide-by-zero (torch would produce NaN there).
    var_denom = feat - 1 if feat > 1 else 1
    var = jnp.sum(centered * centered, axis=-1, keepdims=True) * (1.0 / var_denom)
    std = jnp.sqrt(var)

    # NOTE: eps is added to the std (not the variance), matching the module.
    # Exact per-row reciprocal (TM values) + broadcast multiply; the kernel is
    # memory bound, so an exact reciprocal is free and avoids approx error.
    inv = pl.reciprocal(std + eps, approx=False)             # (TM, 1)

    y = (gamma_ref[...].astype(jnp.float32) * (centered * inv)
         + beta_ref[...].astype(jnp.float32))
    o_ref[...] = y.astype(o_ref.dtype)


def _choose_block_rows(batch, feat_padded, itemsize,
                       target_bytes=4 * 1024 * 1024,
                       vmem_budget_bytes=24 * 1024 * 1024,
                       min_steps=4):
    """Pick a row tile sized by HBM bytes per grid step.

      (a) stream ~target_bytes of x per step so the DMA dwarfs the ~0.35us
          fixed per-grid-step overhead,
      (b) keep the double-buffered in/out tiles PLUS ~3 f32 compiler temps
          (x_f32 / centered / squares) under vmem_budget_bytes,
      (c) keep >= min_steps grid steps when the batch allows it (v7x megacore
          sharding + read/write pipeline overlap),
      (d) round to a dtype-aware sublane multiple (8 f32, 16 bf16, 32 int8).
    The wrapper pads B up to a multiple of the returned block_rows.
    """
    sublane = max(8, 32 // itemsize)
    per_row_vmem = 4 * feat_padded * itemsize + 3 * feat_padded * 4
    vmem_cap = max(sublane, vmem_budget_bytes // per_row_vmem)
    target_rows = max(sublane, target_bytes // (feat_padded * itemsize))
    cap = min(vmem_cap, target_rows, max(batch, sublane))
    if batch >= min_steps * sublane:
        cap = min(cap, pl.cdiv(batch, min_steps))
    return max(sublane, (cap // sublane) * sublane)


def layer_norm(x, gamma, beta, eps=1e-6, block_rows=None):
    """x: (B, F); gamma, beta: (F,). Returns (B, F) in x.dtype."""
    B, F = x.shape
    Fp = pl.cdiv(F, 128) * 128                     # lane-dense feature dim
    if block_rows is None:
        block_rows = _choose_block_rows(B, Fp, x.dtype.itemsize)
    Bp = pl.cdiv(B, block_rows) * block_rows       # pad rows to the row tile

    xp = x
    if Bp != B or Fp != F:
        xp = jnp.pad(x, ((0, Bp - B), (0, Fp - F)))
    gamma2d = gamma.reshape(1, F)
    beta2d = beta.reshape(1, F)
    if Fp != F:
        gamma2d = jnp.pad(gamma2d, ((0, 0), (0, Fp - F)))
        beta2d = jnp.pad(beta2d, ((0, 0), (0, Fp - F)))

    kernel = functools.partial(_layernorm_kernel, eps=eps, feat=F, feat_padded=Fp)

    out = pl.pallas_call(
        kernel,
        out_shape=jax.ShapeDtypeStruct((Bp, Fp), x.dtype),
        grid_spec=pltpu.PrefetchScalarGridSpec(
            num_scalar_prefetch=0,
            grid=(Bp // block_rows,),
            in_specs=[
                pl.BlockSpec((block_rows, Fp), lambda i: (i, 0)),  # x tile
                pl.BlockSpec((1, Fp), lambda i: (0, 0)),           # gamma (once)
                pl.BlockSpec((1, Fp), lambda i: (0, 0)),           # beta  (once)
            ],
            out_specs=pl.BlockSpec((block_rows, Fp), lambda i: (i, 0)),
        ),
        compiler_params=pltpu.CompilerParams(
            dimension_semantics=("parallel",),
            # Above v5e's 16 MiB default scoped limit; below v7x's 64 MiB
            # physical VMEM. The tile chooser budgets ~24 MiB, leaving headroom.
            vmem_limit_bytes=48 * 1024 * 1024,
        ),
    )(xp, gamma2d, beta2d)

    if Bp != B or Fp != F:
        out = out[:B, :F]
    return out


if __name__ == "__main__":
    key = jax.random.PRNGKey(0)

    def reference(x, gamma, beta, eps):
        # torch semantics: unbiased std, eps added to std.
        n = x.shape[-1]
        mean = jnp.mean(x, axis=-1, keepdims=True)
        var = jnp.sum((x - mean) ** 2, axis=-1, keepdims=True) / max(n - 1, 1)
        std = jnp.sqrt(var)
        return gamma * (x - mean) / (std + eps) + beta

    k1, k2 = jax.random.split(key)

    # Case 1: lane-dense / sublane-aligned shapes (no padding path).
    B1, F1 = 64, 128
    x1 = jax.random.normal(k1, (B1, F1), dtype=jnp.float32)
    g1 = jnp.ones((F1,), dtype=jnp.float32)    # nn.Parameter(torch.ones(features))
    b1 = jnp.zeros((F1,), dtype=jnp.float32)   # nn.Parameter(torch.zeros(features))
    out1 = layer_norm(x1, g1, b1, eps=1e-6)
    jax.block_until_ready(out1)
    ref1 = reference(x1, g1, b1, 1e-6)
    assert jnp.allclose(out1, ref1, atol=1e-4, rtol=1e-4), "mismatch (aligned case)"

    # Case 2: unaligned B and F exercise the batch/feature padding + lane-mask
    # path (true-F denominators inside the kernel).
    B2, F2 = 37, 96
    x2 = jax.random.normal(k2, (B2, F2), dtype=jnp.float32)
    g2 = jax.random.normal(jax.random.PRNGKey(1), (F2,), dtype=jnp.float32)
    b2 = jax.random.normal(jax.random.PRNGKey(2), (F2,), dtype=jnp.float32)
    out2 = layer_norm(x2, g2, b2, eps=1e-6)
    jax.block_until_ready(out2)
    ref2 = reference(x2, g2, b2, 1e-6)
    assert jnp.allclose(out2, ref2, atol=1e-4, rtol=1e-4), "mismatch (padded case)"

    print("KERNEL_OK")
</pallas_src>

<mosaic_0001>
module attributes {stable_mosaic.version = 11 : i64} {
  func.func @_layernorm_kernel(%arg0: i32, %arg1: memref<16x128xf32, #tpu.memory_space<vmem>>, %arg2: memref<1x128xf32, #tpu.memory_space<vmem>>, %arg3: memref<1x128xf32, #tpu.memory_space<vmem>>, %arg4: memref<16x128xf32, #tpu.memory_space<vmem>>) attributes {dimension_semantics = [#tpu.dimension_semantics<parallel>], iteration_bounds = array<i64: 4>, scalar_prefetch = 0 : i64, scratch_operands = 0 : i64, tpu.core_type = #tpu.core_type<tc>, window_params = [{transform_indices = @transform_0, window_bounds = array<i64: 16, 128>}, {pipeline_mode = #tpu.pipeline_mode<synchronous>, transform_indices = @transform_1, window_bounds = array<i64: 1, 128>}, {pipeline_mode = #tpu.pipeline_mode<synchronous>, transform_indices = @transform_2, window_bounds = array<i64: 1, 128>}, {transform_indices = @transform_3, window_bounds = array<i64: 16, 128>}]} {
    %c0 = arith.constant 0 : index
    %c0_0 = arith.constant 0 : index
    %0 = vector.load %arg1[%c0, %c0_0] : memref<16x128xf32, #tpu.memory_space<vmem>>, vector<16x128xf32>
    %cst = arith.constant dense<0.000000e+00> : vector<16xf32>
    %1 = vector.multi_reduction <add>, %0, %cst [1] : vector<16x128xf32> to vector<16xf32>
    %2 = vector.shape_cast %1 : vector<16xf32> to vector<16x1xf32>
    %cst_1 = arith.constant 7.812500e-03 : f32
    %3 = vector.broadcast %cst_1 : f32 to vector<16x1xf32>
    %4 = arith.mulf %2, %3 : vector<16x1xf32>
    %5 = vector.broadcast %4 : vector<16x1xf32> to vector<16x128xf32>
    %6 = arith.subf %0, %5 : vector<16x128xf32>
    %7 = arith.mulf %6, %6 : vector<16x128xf32>
    %cst_2 = arith.constant dense<0.000000e+00> : vector<16xf32>
    %8 = vector.multi_reduction <add>, %7, %cst_2 [1] : vector<16x128xf32> to vector<16xf32>
    %9 = vector.shape_cast %8 : vector<16xf32> to vector<16x1xf32>
    %cst_3 = arith.constant 0.00787401571 : f32
    %10 = vector.broadcast %cst_3 : f32 to vector<16x1xf32>
    %11 = arith.mulf %9, %10 : vector<16x1xf32>
    %12 = math.sqrt %11 : vector<16x1xf32>
    %cst_4 = arith.constant 9.99999997E-7 : f32
    %13 = vector.broadcast %cst_4 : f32 to vector<16x1xf32>
    %14 = arith.addf %12, %13 : vector<16x1xf32>
    %15 = tpu.reciprocal %14 : vector<16x1xf32> -> vector<16x1xf32>
    %c0_5 = arith.constant 0 : index
    %c0_6 = arith.constant 0 : index
    %16 = vector.load %arg2[%c0_5, %c0_6] : memref<1x128xf32, #tpu.memory_space<vmem>>, vector<1x128xf32>
    %17 = vector.broadcast %15 : vector<16x1xf32> to vector<16x128xf32>
    %18 = arith.mulf %6, %17 : vector<16x128xf32>
    %19 = vector.broadcast %16 : vector<1x128xf32> to vector<16x128xf32>
    %20 = arith.mulf %19, %18 : vector<16x128xf32>
    %c0_7 = arith.constant 0 : index
    %c0_8 = arith.constant 0 : index
    %21 = vector.load %arg3[%c0_7, %c0_8] : memref<1x128xf32, #tpu.memory_space<vmem>>, vector<1x128xf32>
    %22 = vector.broadcast %21 : vector<1x128xf32> to vector<16x128xf32>
    %23 = arith.addf %20, %22 : vector<16x128xf32>
    %c0_9 = arith.constant 0 : index
    %c0_10 = arith.constant 0 : index
    %24 = vector.load %arg4[%c0_9, %c0_10] : memref<16x128xf32, #tpu.memory_space<vmem>>, vector<16x128xf32>
    tpu.vector_store %arg4[%c0_9, %c0_10], %23 {strides = array<i32>} : memref<16x128xf32, #tpu.memory_space<vmem>>, vector<16x128xf32>,
    return
  }
  func.func @transform_0(%arg0: i32) -> (i32, i32) {
    %c0_i32 = arith.constant 0 : i32
    %c0_i32_0 = arith.constant 0 : i32
    return %arg0, %c0_i32 : i32, i32
  }
  func.func @transform_1(%arg0: i32) -> (i32, i32) {
    %c0_i32 = arith.constant 0 : i32
    %c0_i32_0 = arith.constant 0 : i32
    %c0_i32_1 = arith.constant 0 : i32
    return %c0_i32, %c0_i32_0 : i32, i32
  }
  func.func @transform_2(%arg0: i32) -> (i32, i32) {
    %c0_i32 = arith.constant 0 : i32
    %c0_i32_0 = arith.constant 0 : i32
    %c0_i32_1 = arith.constant 0 : i32
    return %c0_i32, %c0_i32_0 : i32, i32
  }
  func.func @transform_3(%arg0: i32) -> (i32, i32) {
    %c0_i32 = arith.constant 0 : i32
    %c0_i32_0 = arith.constant 0 : i32
    return %arg0, %c0_i32 : i32, i32
  }
}

</mosaic_0001>

<bundles_post_ra>
// kernel: tpu_custom_call.1
= control target key start
LH: loop header
LB: loop body
LE: loop exit
PB: predicated region body
PF: predicated region fallthrough
CT: control target
= control target key end

     0   :  { %8 = vsyncpa [#allocation3], 0  ;;  %s706_s0 = inlined_call_operand.hbm [shape: f32[64,128], index: 0, kind: input, shape index: {}]   ;;  %s707_s1 = inlined_call_operand.vmem [shape: f32[1,128], index: 1, kind: input, shape index: {}]   ;;  %s708_s2 = inlined_call_operand.vmem [shape: f32[1,128], index: 2, kind: input, shape index: {}]   ;;  %s709_s3 = inlined_call_operand.hbm [shape: f32[64,128], index: 3, kind: output, shape index: {}]  }
   0x1   :  { %10 = vsyncpa [#allocation3 + $0x1], 0 }
   0x2   :  { %11 = vsyncpa [#allocation4], 0 }
   0x3   :  { %13 = vsyncpa [#allocation4 + $0x1], 0  ;;  %s536_s12 = smov 0   ;;  %s538_s13 = smov 0  }
   0x4   :  { %s540_s14 = smov 0   ;;  %s542_s15 = smov 0  }
   0x5 LB: > { %s557_s16 = sadd.s32 4294967295, %s508_s15   ;;  %s336_s17 = sadd.s32 4294967294, %s508_s15   ;;  %s508_s15 = sphi %s542_s15, %s721_s15   ;;  %s504_s14 = sphi %s540_s14, %s720_s14   ;;  %s500_s13 = sphi %s538_s13, %s719_s13   ;;  %s496_s12 = sphi %s536_s12, %s718_s12  }
   0x6   : > { %s561_s18 = sadd.s32 1, %s508_s15   ;;  %s26_s19 = sadd.s32 1, %s504_s14 }
   0x7   : > { %s23_s20 = ssub.s32 %s508_s15, %s561_s18  ;;  %p33_p0 = scmp.ne.s32.totalorder %s504_s14, %s500_s13 }
   0x8   : > { %p24_p1 = scmp.eq.s32.totalorder %s23_s20, 0  ;;  %p34_p2 = scmp.eq.s32.totalorder %s508_s15, 0 }
   0x9   : > { %p39_p3 = scmp.ne.s32.totalorder %s500_s13, %s496_s12  ;;  %p40_p4 = scmp.eq.s32.totalorder %s557_s16, 0 }
   0xa   : > { %s573_s21 = scalar_select %p24_p1, %s504_s14, %s26_s19  }
   0xb   : > { %p575_p5 = por %p34_p2, %p33_p0  ;;  %p579_p6 = por %p40_p4, %p39_p3 }
   0xc   : > { %p105_p7 = scmp.eq.s32.totalorder %s557_s16, 3  ;;  %p111_p8 = scmp.eq.s32.totalorder %s336_s17, 3 }
   0xd   : > { %p366_p9 = scmp.lt.s32.totalorder %s508_s15, 4  ;;  %s137_s26 = sand.u32 1, %s504_s14  }
   0xe   : > { %p585_p10 = por %p105_p7, %p33_p0  ;;  %p589_p11 = por %p111_p8, %p39_p3 }
   0xf   : > { %s352_s27 = sshll.u32 %s508_s15, 8  ;;  %s339_s28 = sshll.u32 %s137_s26, 4 }
  0x10   : > { %s713_s24 = scalar_select %p585_p10, 1, 0 }
  0x11   : > { %s714_s25 = scalar_select %p589_p11, 1, 0 }
  0x12   : > { %s598_s4 = scalar_lea.hbm %s706_s0, %s352_s27  ;;  %s141_s5 = scalar_lea.vmem [#allocation2], %s339_s28 }
  0x13   : > { %s148_s6 = sshll.u32 %s141_s5, 4  ;;  %p602_p12 = pnand %p366_p9, %p575_p5  ;;  %s606_s6 = int_to_ptr.vmem [resolvable:$true] %s148_s6 }
  0x14   : > { %s608_s8 = scalar_lea.sflag [#allocation3], %s137_s26  ;;  %s412_s9 = scalar_lea.hbm %s598_s4, 256 }
  0x15   : > { %p413_p13 = scmp.ne.s32.totalorder %s598_s4, %s412_s9  ;;  %p414_p0 = pneg %p602_p12 }
  0x16   : > { %s417_s17 = scalar_lea.hbm %s706_s0, 1024  ;;  %p418_p3 = scmp.lt.u32.totalorder %s598_s4, %s706_s0 }
  0x17   : > { %p415_p1 = pnand %p414_p0, %p413_p13  ;;  %p419_p4 = scmp.lt.u32.totalorder %s417_s17, %s412_s9 }
  0x18   : > { %p421_p7 = scmp.lt.u32.totalorder %s412_s9, %s598_s4 }
  0x19   : > { %p416_p2 = pneg %p415_p1  ;;  %p420_p5 = por %p419_p4, %p418_p3 }
  0x1b   : > { %p422_p8 = por %p421_p7, %p420_p5 }
  0x1d   : > { %p423_p9 = pnand %p422_p8, %p416_p2 }
  0x1f   : > { %426 = shalt.err (!%p423_p9)
}
  0x20   : > { %s427_s22 = scalar_lea.vmem %s606_s6, 256  ;;  %s510_s26 = smov [#allocation2]  }
  0x21   : > { %p428_p13 = scmp.ne.s32.totalorder %s606_s6, %s427_s22  ;;  %s432_s27 = sshll.u32 %s510_s26, 4  ;;  %s433_s27 = int_to_ptr.vmem [resolvable:$false] %s432_s27 }
  0x22   : > { %s434_s28 = scalar_lea.vmem %s433_s27, 512  ;;  %p435_p10 = scmp.lt.s32.totalorder %s606_s6, %s433_s27 }
  0x23   : > { %p430_p1 = pnand %p428_p13, %p414_p0  ;;  %p436_p3 = scmp.lt.s32.totalorder %s434_s28, %s427_s22 }
  0x25   : > { %p431_p11 = pneg %p430_p1  ;;  %p437_p4 = por %p436_p3, %p435_p10 }
  0x27   : > { %p438_p5 = pnand %p437_p4, %p431_p11 }
  0x29   : > { %441 = shalt.err (!%p438_p5)
}
  0x2a   : > { %s511_s29 = smov 128   ;;  %s512_s30 = smov 8  }
  0x2b   : > { %361 = dma.hbm_to_vmem [thread:$0]  (!%p602_p12), %s598_s4, 256, %s606_s6, %s608_s8, %s511_s29, %s511_s29, %s512_s30  }
  0x2c   : > { %p342_p0 = scmp.ge.s32.totalorder %s508_s15, 1  ;;  %p156_p2 = scmp.lt.s32.totalorder %s508_s15, 5 }
  0x2e   : > { %p157_p7 = pnand %p342_p0, %p156_p2 }
  0x2f   : > { %s639_s5 = sand.u32 (!%p157_p7), 1, %s500_s13  }
  0x30   : > { %160 = sbr.rel (%p157_p7) target bundleno = 402 (0x192), region = 32  ;;  %s343_s9 = sshll.u32 (!%p157_p7), %s639_s5, 4 }
  0x31   : > { %s163_s10 = scalar_lea.sflag (!%p157_p7), [#allocation3], %s639_s5  ;;  %s166_s11 = scalar_lea.vmem (!%p157_p7), [#allocation2], %s343_s9 }
  0x37   : > { %487 = dma.done.wait (%p579_p6), %s163_s10, 256  }
  0x38   : > { %489 = vsyncadd (%p579_p6), %s163_s10, 4294967040  ;;  %v191_v0 = vld [vmem:[%s166_s11] sm:$0xff]  ;;  %v192_v1 = vld [vmem:[%s166_s11 + $0x8] sm:$0xff]  ;;  %s353_s8 = sshll.u32 %s557_s16, 8  ;;  %s188_s17 = scalar_lea.vmem [#allocation5], %s343_s9 }
  0x39   : > { %193 = vadd.xlane.f32.xlu0 %v191_v0  ;;  %v345_v27 = vld [vmem:[%s707_s1] ss:$0 sm:$0xff]  ;;  %s263_s19 = sshll.u32 %s188_s17, 4  ;;  %s661_s26 = scalar_lea.hbm %s709_s3, %s353_s8  ;;  %s663_s19 = int_to_ptr.vmem [resolvable:$true] %s263_s19 }
  0x3a   : > { %v346_v29 = vld [vmem:[%s708_s2] ss:$0 sm:$0xff]  ;;  %s250_s27 = scalar_lea.sflag [#allocation4], %s639_s5  ;;  %s442_s28 = scalar_lea.vmem %s663_s19, 256 }
  0x3b   : > { %p443_p6 = scmp.ne.s32.totalorder %s663_s19, %s442_s28  ;;  %p716_p10 = scmp.ne.s32.totalorder %s713_s24, 0 }
  0x3c   : > { %s513_s16 = smov [#allocation5]  }
  0x3d   : > { %195 = vadd.xlane.f32.xlu0 %v192_v1  ;;  %p444_p11 = pnand %p443_p6, %p716_p10  ;;  %s446_s29 = sshll.u32 %s513_s16, 4  ;;  %s447_s29 = int_to_ptr.vmem [resolvable:$false] %s446_s29 }
  0x3e   : > { %s448_s30 = scalar_lea.vmem %s447_s29, 512  ;;  %p449_p8 = scmp.lt.s32.totalorder %s663_s19, %s447_s29 }
  0x3f   : > { %p445_p12 = pneg %p444_p11  ;;  %p450_p9 = scmp.lt.s32.totalorder %s448_s30, %s442_s28 }
  0x41   : > { %p451_p13 = por %p450_p9, %p449_p8 }
  0x43   : > { %p452_p1 = pnand %p451_p13, %p445_p12 }
  0xc6   : > { %v194_v2 = vpop.xlane.xlu0 %193 }
  0xc7   : > { %v197_v3 = vmul.f32 0.0078125, %v194_v2 }
  0xc9   : > { %v199_v4 = vsub.f32 %v191_v0, %v197_v3 }
  0xca   : > { %v196_v5 = vpop.xlane.xlu0 %195 }
  0xcb   : > { %v198_v6 = vmul.f32 0.0078125, %v196_v5  ;;  %v201_v7 = vmul.f32 %v199_v4, %v199_v4 }
  0xcd   : > { %v200_v8 = vsub.f32 %v192_v1, %v198_v6  ;;  %203 = vadd.xlane.f32.xlu1 %v201_v7 }
  0xcf   : > { %v202_v9 = vmul.f32 %v200_v8, %v200_v8 }
  0xd1   : > { %205 = vadd.xlane.f32.xlu1 %v202_v9 }
 0x15a   : > { %v204_v10 = vpop.xlane.xlu1 %203 }
 0x15b   : > { %v207_v11 = vmul.f32 0.007874016, %v204_v10 }
 0x15d   : > { %404 = vrsqrt.f32 %v207_v11  ;;  %vm211_vm0 = vcmp.eq.f32.partialorder %v207_v11, inf  ;;  %v214_v16 = vand.u32 2147483648, %v207_v11  ;;  %vm213_vm1 = vcmp.eq.f32.partialorder %v207_v11, 0.0 }
 0x15e   : > { %v206_v12 = vpop.xlane.xlu1 %205 }
 0x15f   : > { %v208_v13 = vmul.f32 0.007874016, %v206_v12 }
 0x161   : > { %406 = vrsqrt.f32 %v208_v13  ;;  %vm218_vm2 = vcmp.eq.f32.partialorder %v208_v13, inf  ;;  %v221_v22 = vand.u32 2147483648, %v208_v13  ;;  %vm220_vm3 = vcmp.eq.f32.partialorder %v208_v13, 0.0 }
 0x167   : > { %v405_v14 = vpop.eup %404 }
 0x168   : > { %v210_v15 = vmul.f32 %v405_v14, %v207_v11 }
 0x16a   : > { %v212_v17 = vsel %vm211_vm0, %v207_v11, %v210_v15 }
 0x16b   : > { %v407_v18 = vpop.eup %406  ;;  %v215_v19 = vsel %vm213_vm1, %v214_v16, %v212_v17 }
 0x16c   : > { %v223_v20 = vadd.f32 1e-06, %v215_v19  ;;  %v217_v21 = vmul.f32 %v407_v18, %v208_v13 }
 0x16e   : > { %408 = vrcp.f32 %v223_v20  ;;  %v219_v23 = vsel %vm218_vm2, %v208_v13, %v217_v21 }
 0x16f   : > { %v222_v24 = vsel %vm220_vm3, %v221_v22, %v219_v23 }
 0x170   : > { %v224_v25 = vadd.f32 1e-06, %v222_v24 }
 0x172   : > { %410 = vrcp.f32 %v224_v25 }
 0x178   : > { %v409_v26 = vpop.eup %408 }
 0x179   : > { %v228_v28 = vmul.f32 %v409_v26, %v199_v4 }
 0x17b   : > { %v236_v30 = vmul.f32 %v345_v27, %v228_v28 }
 0x17c   : > { %v411_v31 = vpop.eup %410 }
 0x17d   : > { %v229_v32 = vmul.f32 %v411_v31, %v200_v8  ;;  %v245_v33 = vadd.f32 %v346_v29, %v236_v30 }
 0x17f   : > { %v237_v34 = vmul.f32 %v345_v27, %v229_v32  ;;  %247 = vst [vmem:[%s188_s17] sm:$0xff] %v245_v33 }
 0x181   : > { %v246_v35 = vadd.f32 %v346_v29, %v237_v34 }
 0x183   : > { %248 = vst [vmem:[%s188_s17 + $0x8] sm:$0xff] %v246_v35 }
 0x184   : > { %455 = shalt.err (!%p452_p1)
}
 0x185   : > { %s456_s9 = scalar_lea.hbm %s661_s26, 256  ;;  %s460_s23 = scalar_lea.hbm %s709_s3, 1024 }
 0x186   : > { %p457_p3 = scmp.ne.s32.totalorder %s661_s26, %s456_s9  ;;  %p461_p0 = scmp.lt.u32.totalorder %s661_s26, %s709_s3 }
 0x187   : > { %p462_p2 = scmp.lt.u32.totalorder %s460_s23, %s456_s9  ;;  %p464_p6 = scmp.lt.u32.totalorder %s456_s9, %s661_s26 }
 0x188   : > { %p458_p4 = pnand %p457_p3, %p716_p10 }
 0x189   : > { %p463_p7 = por %p462_p2, %p461_p0 }
 0x18a   : > { %p459_p5 = pneg %p458_p4 }
 0x18b   : > { %p465_p11 = por %p464_p6, %p463_p7 }
 0x18d   : > { %p466_p12 = pnand %p465_p11, %p459_p5 }
 0x18f   : > { %469 = shalt.err (!%p466_p12)
}
 0x190   : > { %s514_s7 = smov 128   ;;  %s515_s8 = smov 8  }
 0x191   : > { %356 = dma.vmem_to_hbm [thread:$0]  (%p716_p10), %s663_s19, 256, %s661_s26, %s250_s27, %s514_s7, %s514_s7, %s515_s8  }
 0x192 PF: > { %p367_p8 = scmp.ge.s32.totalorder %s508_s15, 2  ;;  %s278_s17 = sand.u32 1, %s496_s12  }
 0x193   : > { %p717_p9 = scmp.ne.s32.totalorder %s714_s25, 0  ;;  %s279_s20 = scalar_lea.sflag [#allocation4], %s278_s17 }
 0x195   : > { %p363_p13 = pnand %p367_p8, %p717_p9 }
 0x197   : > { %491 = dma.done.wait (!%p363_p13), %s279_s20, 256  }
 0x198   : > { %493 = vsyncadd (!%p363_p13), %s279_s20, 4294967040  ;;  %p16_p1 = scmp.ge.s32.totalorder %s561_s18, 6   ;;  %s718_s12 = smov %s500_s13 }
 0x199   : > { %s719_s13 = smov %s504_s14  ;;  %s720_s14 = smov %s573_s21 }
 0x19a   : > { %s721_s15 = smov %s561_s18  ;;  %18 = sbr.rel (!%p16_p1) target bundleno = 5 (0x5), region = 77 }
 0x1a1   :  { %284 = vsyncpa [#allocation3], 1 }
 0x1a2   :  { %286 = vsyncpa [#allocation3 + $0x1], 1 }
 0x1a3   :  { %287 = vsyncpa [#allocation4], 1 }
 0x1a4   :  { %289 = vsyncpa [#allocation4 + $0x1], 1 }

</bundles_post_ra>
